<compile_context>
chip_gen: v5e
topology: v5e:2x2
jax: 0.10.0
libtpu: 0.0.40
codegen_flags: <defaults>
</compile_context>

<pallas_src>
import jax
import jax.numpy as jnp
from jax.experimental import pallas as pl
from jax.experimental.pallas import tpu as pltpu


def _final_layer_kernel(x_ref, mod_ref, wl_ref, bl_ref, o_ref):
    # Shapes inside the kernel (grid step (b, t)):
    #   x_ref   : (TT, C)         token tile of one batch element (batch squeezed)
    #   mod_ref : (B, 2, C) f32   resident adaLN shift/scale (row 0 = shift, 1 = scale)
    #   wl_ref  : (C, Dout_pad)   final Linear weight (pre-transposed, lane-padded)
    #   bl_ref  : (1, Dout_pad)   f32 bias (lane-padded)
    #   o_ref   : (TT, Dout)      unpadded output tile
    b = pl.program_id(0)
    x = x_ref[...].astype(jnp.float32)

    # --- LayerNorm (no affine, eps=1e-6) over channels, stats in f32 ---
    mu = jnp.mean(x, axis=-1, keepdims=True)
    xc = x - mu
    var = jnp.mean(xc * xc, axis=-1, keepdims=True)
    xn = xc * jax.lax.rsqrt(var + 1e-6)

    # --- modulate: x * (1 + scale) + shift (per-batch row of the resident params) ---
    params = mod_ref[b]            # (2, C), f32
    shift = params[0:1, :]
    scale = params[1:2, :]
    mod = xn * (1.0 + scale) + shift

    # --- final Linear on the MXU; operands follow weight dtype, f32 accumulate ---
    out = jnp.dot(mod.astype(wl_ref.dtype), wl_ref[...],
                  preferred_element_type=jnp.float32)
    out = out + bl_ref[...]        # bias kept in f32

    dout = o_ref.shape[-1]
    o_ref[...] = out[:, :dout].astype(o_ref.dtype)


def _vmem_cap_bytes():
    """Physical per-TensorCore VMEM capacity (falls back to the v7x minimum)."""
    try:
        info = pltpu.get_tpu_info()
        cap = getattr(info, "vmem_capacity_bytes", None)
        if cap:
            return int(cap)
    except Exception:
        pass
    return 64 << 20  # conservative: v7x has 64 MiB / TC


def final_layer(x, c, w_ada, b_ada, w_lin, b_lin, *, t_tile=512,
                mxu_dtype=jnp.bfloat16):
    """FinalLayer forward.

    x: (B, T, C), c: (B, C)
    w_ada: (2C, C), b_ada: (2C,)   -- PyTorch Linear layout (out, in)
    w_lin: (Dout, C), b_lin: (Dout,)
    mxu_dtype: operand dtype for the final matmul (default bf16; pass None to
               keep the weight's native dtype, e.g. for a bit-faithful f32 path).
    """
    B, T, C = x.shape
    Dout = w_lin.shape[0]

    # ---- adaLN hoisted to XLA (one batched matmul; keeps (C,2C) out of VMEM) ----
    c32 = c.astype(jnp.float32)
    silu = c32 * jax.nn.sigmoid(c32)
    ada = silu @ w_ada.astype(jnp.float32).T + b_ada.astype(jnp.float32)  # (B, 2C)
    shift, scale = ada[:, :C], ada[:, C:]
    # Resident, f32 regardless of x dtype (tiny: B*2*C*4 bytes).
    mod_params = jnp.stack([shift, scale], axis=1)                        # (B, 2, C) f32

    # ---- MXU-facing weight: lane-pad N up to a multiple of 128, bias stays f32 ----
    Dout_pad = max(128, ((Dout + 127) // 128) * 128)
    # TODO(synk): fold the transpose/pad/cast into static weight storage to avoid
    # re-doing this glue per call when weights are constants.
    wl_pad = jnp.pad(jnp.transpose(w_lin), ((0, 0), (0, Dout_pad - Dout)))
    if mxu_dtype is not None:
        wl_pad = wl_pad.astype(mxu_dtype)
    bl_pad = jnp.pad(b_lin.astype(jnp.float32), (0, Dout_pad - Dout)).reshape(1, Dout_pad)

    # ---- token tiling (t_tile multiple of 16 so bf16 sublane packing is clean) ----
    TT = T if T <= t_tile else t_tile
    grid = (B, pl.cdiv(T, TT))

    # ---- VMEM budget (explicit, with headroom; capped by device capacity) ----
    x_itemsize = x.dtype.itemsize
    w_itemsize = wl_pad.dtype.itemsize
    vmem_need = (
        2 * TT * C * x_itemsize                      # x tile, double-buffered
        + 2 * TT * Dout * x_itemsize                 # out tile, double-buffered
        + B * 2 * C * 4                              # resident shift/scale (f32)
        + (C + 1) * Dout_pad * w_itemsize            # resident weight+bias
        + TT * Dout_pad * 4                          # f32 matmul result scratch
    )
    cap = _vmem_cap_bytes()
    vmem_limit = min(max(2 * int(vmem_need), 8 << 20) + (4 << 20), cap - (12 << 20))
    vmem_limit = max(vmem_limit, 8 << 20)

    cost = pl.CostEstimate(
        flops=2 * B * T * C * Dout_pad,
        transcendentals=0,
        bytes_accessed=int(
            B * T * C * x_itemsize                   # read x
            + B * T * Dout * x_itemsize              # write out (unpadded)
            + B * 2 * C * 4                          # shift/scale
            + (C + 1) * Dout_pad * w_itemsize        # weight + bias
        ),
    )

    return pl.pallas_call(
        _final_layer_kernel,
        out_shape=jax.ShapeDtypeStruct((B, T, Dout), x.dtype),
        grid_spec=pltpu.PrefetchScalarGridSpec(
            num_scalar_prefetch=0,
            grid=grid,
            in_specs=[
                # batch dim squeezed out of the kernel view (None = Squeezed).
                # (Optional sweep: pipeline_mode=pl.Buffered(3) at TT >= 512.)
                pl.BlockSpec((None, TT, C), lambda b, t: (b, t, 0)),
                # resident adaLN params: constant block -> single-buffered
                pl.BlockSpec((B, 2, C), lambda b, t: (0, 0, 0),
                             pipeline_mode=pl.Buffered(1)),
                # resident weight/bias: constant block -> single-buffered
                pl.BlockSpec((C, Dout_pad), lambda b, t: (0, 0),
                             pipeline_mode=pl.Buffered(1)),
                pl.BlockSpec((1, Dout_pad), lambda b, t: (0, 0),
                             pipeline_mode=pl.Buffered(1)),
            ],
            out_specs=pl.BlockSpec((None, TT, Dout), lambda b, t: (b, t, 0)),
        ),
        compiler_params=pltpu.CompilerParams(
            dimension_semantics=("parallel", "parallel"),
            vmem_limit_bytes=int(vmem_limit),
        ),
        cost_estimate=cost,
    )(x, mod_params, wl_pad, bl_pad)


def final_layer_ref(x, c, w_ada, b_ada, w_lin, b_lin):
    """Pure-JAX reference matching the PyTorch module semantics."""
    silu = c * jax.nn.sigmoid(c)
    ada = silu @ w_ada.T + b_ada
    C = c.shape[-1]
    shift, scale = ada[:, :C], ada[:, C:]
    mu = jnp.mean(x, axis=-1, keepdims=True)
    var = jnp.mean((x - mu) ** 2, axis=-1, keepdims=True)
    xn = (x - mu) * jax.lax.rsqrt(var + 1e-6)
    mod = xn * (1.0 + scale[:, None, :]) + shift[:, None, :]
    return mod @ w_lin.T + b_lin


if __name__ == "__main__":
    # Small shapes consistent with the module:
    #   n_ch = 32, patch_size = 2, out_channels = 4  -> Dout = 2*2*4 = 16
    B, T, C = 2, 8, 32
    patch_size, out_channels = 2, 4
    Dout = patch_size * patch_size * out_channels

    key = jax.random.PRNGKey(0)
    kx, kc, kwa, kba, kwl, kbl = jax.random.split(key, 6)

    x = jax.random.normal(kx, (B, T, C), dtype=jnp.float32)
    c = jax.random.normal(kc, (B, C), dtype=jnp.float32)

    # Deterministic synthetic parameters (PyTorch Linear layout: (out, in)).
    bound = 1.0 / jnp.sqrt(C)
    w_ada = jax.random.uniform(kwa, (2 * C, C), jnp.float32, -bound, bound)
    b_ada = jax.random.uniform(kba, (2 * C,), jnp.float32, -bound, bound)
    w_lin = jax.random.uniform(kwl, (Dout, C), jnp.float32, -bound, bound)
    b_lin = jax.random.uniform(kbl, (Dout,), jnp.float32, -bound, bound)

    ref = final_layer_ref(x, c, w_ada, b_ada, w_lin, b_lin)

    # Exact path: f32 MXU operands, tight tolerance.
    out_f32 = jax.block_until_ready(
        final_layer(x, c, w_ada, b_ada, w_lin, b_lin, mxu_dtype=None))
    assert out_f32.shape == (B, T, Dout)
    assert jnp.allclose(out_f32, ref, atol=1e-4, rtol=1e-4), "f32 mismatch vs reference"

    # Default (recommended) path: bf16 MXU operands, looser tolerance.
    out_bf = jax.block_until_ready(
        final_layer(x, c, w_ada, b_ada, w_lin, b_lin))
    assert out_bf.shape == (B, T, Dout)
    assert jnp.allclose(out_bf, ref, atol=5e-2, rtol=5e-2), "bf16 mismatch vs reference"

    print("KERNEL_OK")
</pallas_src>

<mosaic_0001>
module attributes {stable_mosaic.version = 11 : i64} {
  func.func @_final_layer_kernel(%arg0: i32, %arg1: i32, %arg2: memref<1x8x32xf32, #tpu.memory_space<vmem>>, %arg3: memref<2x2x32xf32, #tpu.memory_space<vmem>>, %arg4: memref<32x128xf32, #tpu.memory_space<vmem>>, %arg5: memref<1x128xf32, #tpu.memory_space<vmem>>, %arg6: memref<1x8x16xf32, #tpu.memory_space<vmem>>) attributes {dimension_semantics = [#tpu.dimension_semantics<parallel>, #tpu.dimension_semantics<parallel>], iteration_bounds = array<i64: 2, 1>, scalar_prefetch = 0 : i64, scratch_operands = 0 : i64, tpu.core_type = #tpu.core_type<tc>, window_params = [{transform_indices = @transform_0, window_bounds = array<i64: 1, 8, 32>}, {pipeline_mode = #tpu.pipeline_mode<synchronous>, transform_indices = @transform_1, window_bounds = array<i64: 2, 2, 32>}, {pipeline_mode = #tpu.pipeline_mode<synchronous>, transform_indices = @transform_2, window_bounds = array<i64: 32, 128>}, {pipeline_mode = #tpu.pipeline_mode<synchronous>, transform_indices = @transform_3, window_bounds = array<i64: 1, 128>}, {transform_indices = @transform_4, window_bounds = array<i64: 1, 8, 16>}]} {
    %c0 = arith.constant 0 : index
    %c0_0 = arith.constant 0 : index
    %c0_1 = arith.constant 0 : index
    %0 = vector.load %arg2[%c0, %c0_0, %c0_1] : memref<1x8x32xf32, #tpu.memory_space<vmem>>, vector<1x8x32xf32>
    %1 = vector.shape_cast %0 : vector<1x8x32xf32> to vector<8x32xf32>
    %cst = arith.constant dense<0.000000e+00> : vector<8xf32>
    %2 = vector.multi_reduction <add>, %1, %cst [1] : vector<8x32xf32> to vector<8xf32>
    %3 = vector.shape_cast %2 : vector<8xf32> to vector<8x1xf32>
    %cst_2 = arith.constant 3.200000e+01 : f32
    %4 = vector.broadcast %cst_2 : f32 to vector<8x1xf32>
    %5 = arith.divf %3, %4 : vector<8x1xf32>
    %6 = vector.broadcast %5 : vector<8x1xf32> to vector<8x32xf32>
    %7 = arith.subf %1, %6 : vector<8x32xf32>
    %8 = arith.mulf %7, %7 : vector<8x32xf32>
    %cst_3 = arith.constant dense<0.000000e+00> : vector<8xf32>
    %9 = vector.multi_reduction <add>, %8, %cst_3 [1] : vector<8x32xf32> to vector<8xf32>
    %10 = vector.shape_cast %9 : vector<8xf32> to vector<8x1xf32>
    %cst_4 = arith.constant 3.200000e+01 : f32
    %11 = vector.broadcast %cst_4 : f32 to vector<8x1xf32>
    %12 = arith.divf %10, %11 : vector<8x1xf32>
    %cst_5 = arith.constant 9.99999997E-7 : f32
    %13 = vector.broadcast %cst_5 : f32 to vector<8x1xf32>
    %14 = arith.addf %12, %13 : vector<8x1xf32>
    %15 = math.rsqrt %14 : vector<8x1xf32>
    %16 = vector.broadcast %15 : vector<8x1xf32> to vector<8x32xf32>
    %17 = arith.mulf %7, %16 : vector<8x32xf32>
    %18 = arith.index_cast %arg0 : i32 to index
    %c0_6 = arith.constant 0 : index
    %c0_7 = arith.constant 0 : index
    %19 = vector.load %arg3[%18, %c0_6, %c0_7] : memref<2x2x32xf32, #tpu.memory_space<vmem>>, vector<1x2x32xf32>
    %20 = vector.shape_cast %19 : vector<1x2x32xf32> to vector<2x32xf32>
    %21 = vector.extract_strided_slice %20 {offsets = [0, 0], sizes = [1, 32], strides = [1, 1]} : vector<2x32xf32> to vector<1x32xf32>
    %22 = vector.extract_strided_slice %20 {offsets = [1, 0], sizes = [1, 32], strides = [1, 1]} : vector<2x32xf32> to vector<1x32xf32>
    %cst_8 = arith.constant 1.000000e+00 : f32
    %23 = vector.broadcast %cst_8 : f32 to vector<1x32xf32>
    %24 = arith.addf %23, %22 : vector<1x32xf32>
    %25 = vector.broadcast %24 : vector<1x32xf32> to vector<8x32xf32>
    %26 = arith.mulf %17, %25 : vector<8x32xf32>
    %27 = vector.broadcast %21 : vector<1x32xf32> to vector<8x32xf32>
    %28 = arith.addf %26, %27 : vector<8x32xf32>
    %c0_9 = arith.constant 0 : index
    %c0_10 = arith.constant 0 : index
    %29 = vector.load %arg4[%c0_9, %c0_10] : memref<32x128xf32, #tpu.memory_space<vmem>>, vector<32x128xf32>
    %cst_11 = arith.constant dense<0.000000e+00> : vector<8x128xf32>
    %30 = tpu.matmul %28, %29, %cst_11 {dimension_numbers = #tpu.dot_dimension_numbers<[1], [0], [0], [1], [0, 0, 1, 1], [], []>} : vector<8x32xf32>, vector<32x128xf32>, vector<8x128xf32> -> vector<8x128xf32>
    %c0_12 = arith.constant 0 : index
    %c0_13 = arith.constant 0 : index
    %31 = vector.load %arg5[%c0_12, %c0_13] : memref<1x128xf32, #tpu.memory_space<vmem>>, vector<1x128xf32>
    %32 = vector.broadcast %31 : vector<1x128xf32> to vector<8x128xf32>
    %33 = arith.addf %30, %32 : vector<8x128xf32>
    %34 = vector.extract_strided_slice %33 {offsets = [0, 0], sizes = [8, 16], strides = [1, 1]} : vector<8x128xf32> to vector<8x16xf32>
    %c0_14 = arith.constant 0 : index
    %c0_15 = arith.constant 0 : index
    %c0_16 = arith.constant 0 : index
    %35 = vector.load %arg6[%c0_14, %c0_15, %c0_16] : memref<1x8x16xf32, #tpu.memory_space<vmem>>, vector<1x8x16xf32>
    %36 = vector.shape_cast %35 : vector<1x8x16xf32> to vector<8x16xf32>
    %37 = vector.shape_cast %34 : vector<8x16xf32> to vector<1x8x16xf32>
    tpu.vector_store %arg6[%c0_14, %c0_15, %c0_16], %37 {strides = array<i32>} : memref<1x8x16xf32, #tpu.memory_space<vmem>>, vector<1x8x16xf32>,
    return
  }
  func.func @transform_0(%arg0: i32, %arg1: i32) -> (i32, i32, i32) {
    %c0_i32 = arith.constant 0 : i32
    %c0_i32_0 = arith.constant 0 : i32
    return %arg0, %arg1, %c0_i32 : i32, i32, i32
  }
  func.func @transform_1(%arg0: i32, %arg1: i32) -> (i32, i32, i32) {
    %c0_i32 = arith.constant 0 : i32
    %c0_i32_0 = arith.constant 0 : i32
    %c0_i32_1 = arith.constant 0 : i32
    %c0_i32_2 = arith.constant 0 : i32
    return %c0_i32, %c0_i32_0, %c0_i32_1 : i32, i32, i32
  }
  func.func @transform_2(%arg0: i32, %arg1: i32) -> (i32, i32) {
    %c0_i32 = arith.constant 0 : i32
    %c0_i32_0 = arith.constant 0 : i32
    %c0_i32_1 = arith.constant 0 : i32
    return %c0_i32, %c0_i32_0 : i32, i32
  }
  func.func @transform_3(%arg0: i32, %arg1: i32) -> (i32, i32) {
    %c0_i32 = arith.constant 0 : i32
    %c0_i32_0 = arith.constant 0 : i32
    %c0_i32_1 = arith.constant 0 : i32
    return %c0_i32, %c0_i32_0 : i32, i32
  }
  func.func @transform_4(%arg0: i32, %arg1: i32) -> (i32, i32, i32) {
    %c0_i32 = arith.constant 0 : i32
    %c0_i32_0 = arith.constant 0 : i32
    return %arg0, %arg1, %c0_i32 : i32, i32, i32
  }
}

</mosaic_0001>

<bundles_post_ra>
// kernel: tpu_custom_call.1
= control target key start
LH: loop header
LB: loop body
LE: loop exit
PB: predicated region body
PF: predicated region fallthrough
CT: control target
= control target key end

     0   :  { %9 = vsyncpa [#allocation3], 0  ;;  %s932_s0 = inlined_call_operand.hbm [shape: f32[2,8,32], index: 0, kind: input, shape index: {}]   ;;  %s933_s1 = inlined_call_operand.hbm [shape: f32[2,2,32], index: 1, kind: input, shape index: {}]   ;;  %s934_s2 = inlined_call_operand.hbm [shape: f32[32,128], index: 2, kind: input, shape index: {}]   ;;  %s935_s3 = inlined_call_operand.vmem [shape: f32[1,128], index: 3, kind: input, shape index: {}]   ;;  %s936_s4 = inlined_call_operand.hbm [shape: f32[2,8,16], index: 4, kind: output, shape index: {}]  }
   0x1   :  { %11 = vsyncpa [#allocation3 + $0x1], 0 }
   0x2   :  { %12 = vsyncpa [#allocation6], 0 }
   0x3   :  { %13 = vsyncpa [#allocation4], 0 }
   0x4   :  { %15 = vsyncpa [#allocation4 + $0x1], 0  ;;  %s777_s15 = smov 0   ;;  %s779_s16 = smov 0  }
   0x5   :  { %s781_s17 = smov 0   ;;  %s783_s18 = smov 0  }
   0x6   :  { %s785_s19 = smov 0   ;;  %s787_s20 = smov 0  }
   0x7 LB: > { %s455_s21 = sadd.s32 4294967295, %s743_s20   ;;  %p457_p0 = scmp.ge.s32.totalorder %s743_s20, 1  ;;  %s743_s20 = sphi %s787_s20, %s21_s20   ;;  %s739_s19 = sphi %s785_s19, %s946_s19   ;;  %s735_s18 = sphi %s783_s18, %s945_s18   ;;  %s731_s17 = sphi %s781_s17, %s944_s17   ;;  %s727_s16 = sphi %s779_s16, %s943_s16   ;;  %s723_s15 = sphi %s777_s15, %s942_s15  }
   0x8   : > { %p811_p1 = scmp.eq.s32.totalorder %s455_s21, 0  ;;  %p157_p2 = scmp.lt.s32.totalorder %s743_s20, 3 }
   0x9   : > { %s168_s25 = sshll.u32 %s933_s1, 4  ;;  %s745_s27 = smov [#allocation5]   ;;  %s169_s25 = int_to_ptr.hbm [resolvable:$true] %s168_s25 }
   0xa   : > { %p819_p3 = pnand %p457_p0, %p157_p2  ;;  %s170_s28 = sshll.u32 %s745_s27, 4  ;;  %s171_s28 = int_to_ptr.vmem [resolvable:$true] %s170_s28 }
   0xb   : > { %p460_p6 = scmp.ge.s32.totalorder %s743_s20, 2  ;;  %s182_s5 = sshll.u32 %s934_s2, 4  ;;  %s183_s5 = int_to_ptr.hbm [resolvable:$true] %s182_s5 }
   0xc   : > { %p486_p4 = pneg %p819_p3  ;;  %s746_s6 = smov 32  }
   0xd   : > { %s747_s7 = smov 2   ;;  %s748_s8 = smov [#allocation7]  }
   0xe   : > { %p487_p5 = pnand %p486_p4, %p811_p1  ;;  %s184_s9 = sshll.u32 %s748_s8, 4  ;;  %s185_s9 = int_to_ptr.vmem [resolvable:$true] %s184_s9 }
   0xf   : > { %s749_s10 = smov 128   ;;  %s750_s11 = smov 8  }
  0x10   : > { %489 = dma.hbm_to_vmem [thread:$0]  (!%p487_p5), %s169_s25, 64, %s171_s28, [#allocation6], %s746_s6, %s746_s6, %s747_s7  }
  0x11   : > { %492 = dma.hbm_to_vmem [thread:$0]  (!%p487_p5), %s183_s5, 512, %s185_s9, [#allocation6], %s749_s10, %s749_s10, %s750_s11  }
  0x12   : > { %s33_s12 = sadd.s32 1, %s739_s19  ;;  %s456_s13 = sadd.s32 4294967294, %s743_s20  }
  0x13   : > { %p35_p7 = scmp.ge.s32.totalorder %s33_s12, 2  ;;  %s42_s14 = sadd.s32 1, %s731_s17 }
  0x14   : > { %p49_p8 = scmp.ne.s32.totalorder %s731_s17, %s727_s16  ;;  %p50_p9 = scmp.eq.s32.totalorder %s743_s20, 0 }
  0x15   : > { %s948_s12 = smov (%p35_p7, %s33_s12), 0  ;;  %p55_p10 = scmp.ne.s32.totalorder %s727_s16, %s723_s15 }
  0x16   : > { %s37_s23 = ssub.s32 %s739_s19, %s948_s12  ;;  %p144_p11 = scmp.eq.s32.totalorder %s455_s21, 1 }
  0x17   : > { %p40_p12 = scmp.eq.s32.totalorder %s37_s23, 0  ;;  %p847_p13 = por %p811_p1, %p55_p10 }
  0x18   : > { %p851_p0 = por %p144_p11, %p49_p8  ;;  %p150_p2 = scmp.eq.s32.totalorder %s456_s13, 1 }
  0x19   : > { %s856_s27 = scalar_select %p40_p12, %s731_s17, %s42_s14  }
  0x1a   : > { %p51_p4 = por %p50_p9, %p49_p8  ;;  %p858_p5 = por %p150_p2, %p55_p10 }
  0x1b   : > { %s201_s29 = sand.u32 1, %s731_s17   ;;  %s462_s21 = sshll.u32 %s739_s19, 3 }
  0x1c   : > { %p503_p7 = scmp.lt.s32.totalorder %s743_s20, 2  ;;  %s461_s30 = sshll.u32 %s201_s29, 3 }
  0x1d   : > { %s210_s7 = scalar_lea.hbm %s932_s0, %s462_s21  ;;  %s205_s9 = scalar_lea.vmem [#allocation2], %s461_s30 }
  0x1e   : > { %s212_s8 = sshll.u32 %s210_s7, 4  ;;  %s214_s10 = sshll.u32 %s205_s9, 4  ;;  %s213_s8 = int_to_ptr.hbm [resolvable:$true] %s212_s8  ;;  %s215_s10 = int_to_ptr.vmem [resolvable:$true] %s214_s10 }
  0x1f   : > { %p494_p11 = pnand %p503_p7, %p51_p4  ;;  %s202_s11 = scalar_lea.sflag [#allocation3], %s201_s29 }
  0x20   : > { %223 = sbr.rel (%p819_p3) target bundleno = 440 (0x1b8), region = 36  ;;  %s871_s13 = sand.u32 (!%p819_p3), 1, %s727_s16  }
  0x21   : > { %496 = dma.hbm_to_vmem [thread:$0]  (!%p494_p11), %s213_s8, 128, %s215_s10, %s202_s11  }
  0x22   : > { %s464_s14 = sshll.u32 (!%p819_p3), %s871_s13, 3  ;;  %s226_s23 = scalar_lea.sflag (!%p819_p3), [#allocation3], %s871_s13 }
  0x23   : > { %s229_s21 = scalar_lea.vmem (!%p819_p3), [#allocation2], %s464_s14 }
  0x25   : > { %710 = dma.done.wait (%p847_p13), %s226_s23, 128  }
  0x26   : > { %712 = vsyncadd (%p847_p13), %s226_s23, 4294967168 }
  0x27   : > { %714 = dma.done.wait (%p811_p1), [#allocation6], 576  }
  0x28   : > { %716 = vsyncadd (%p811_p1), [#allocation6], 4294966720  ;;  %vm266_vm0 = vcmask 261120   ;;  %v265_v0 = vld [vmem:[%s229_s21] sm:$0xff]  ;;  %v751_v2 = vmov 32.0   ;;  %v304_v17 = vld [vmem:[#allocation7] sm:$0xff] }
  0x29   : > { %v267_v1 = vsel %vm266_vm0, %v265_v0, 0.0  ;;  %563 = vrcp.f32 %v751_v2  ;;  %v307_v14 = vld [vmem:[#allocation7 + $0x18] sm:$0xff]  ;;  %v306_v15 = vld [vmem:[#allocation7 + $0x10] sm:$0xff]  ;;  %v305_v16 = vld [vmem:[#allocation7 + $0x8] sm:$0xff]  ;;  %s468_s22 = sshll.u32 %s735_s18, 1  ;;  %s471_s24 = sshll.u32 %s735_s18, 3 }
  0x2a   : > { %268 = vadd.xlane.f32.xlu0 %v267_v1  ;;  %327 = vmatpush.msra.mxu0 %v307_v14  ;;  %s297_s26 = scalar_lea.vmem [#allocation5], %s468_s22  ;;  %s349_s5 = scalar_lea.hbm %s936_s4, %s471_s24  ;;  %v562_v35 = vld [vmem:[%s935_s3] ss:$0 sm:$0xff]  ;;  %vm335_vm5 = vcmask 130048  }
  0x2b   : > { %v298_v24 = vld [vmem:[%s297_s26] sm:$0x3]  ;;  %s264_s8 = scalar_lea.vmem [#allocation8], %s464_s14  ;;  %s353_s10 = sshll.u32 %s349_s5, 4  ;;  %s354_s10 = int_to_ptr.hbm [resolvable:$true] %s353_s10 }
  0x2c   : > { %328 = vmatpush.msra.mxu0 %v306_v15  ;;  %v299_v26 = vadd.f32 1.0, %v298_v24  ;;  %v302_v32 = vperm.slane %v298_v24, 0  ;;  %s351_s9 = sshll.u32 %s264_s8, 4  ;;  %s338_s18 = scalar_lea.sflag [#allocation4], %s871_s13  ;;  %s352_s9 = int_to_ptr.vmem [resolvable:$true] %s351_s9 }
  0x2d   : > { %s671_s11 = sshra.s32 %s354_s10, 4  ;;  %s677_s14 = scalar_lea.hbm %s936_s4, 16  ;;  %s672_s11 = int_to_ptr.hbm [resolvable:$true] %s671_s11 }
  0x2e   : > { %329 = vmatpush.msra.mxu0 %v305_v16  ;;  %v300_v29 = vperm.slane %v299_v26, 1  ;;  %s673_s23 = scalar_lea.hbm %s672_s11, 8  ;;  %p678_p9 = scmp.lt.s32.totalorder %s672_s11, %s936_s4 }
  0x2f   : > { %v564_v3 = vpop.eup %563  ;;  %p674_p1 = scmp.ne.s32.totalorder %s672_s11, %s673_s23  ;;  %p679_p10 = scmp.lt.s32.totalorder %s677_s14, %s673_s23 }
  0x30   : > { %v271_v4 = vmul.f32 32.0, %v564_v3  ;;  %vm275_vm1 = vweird.f32 %v564_v3  ;;  %330 = vmatpush.msra.mxu0 %v304_v17 }
  0x31   : > { %p675_p3 = pnand %p674_p1, %p851_p0  ;;  %p680_p12 = por %p679_p10, %p678_p9 }
  0x32   : > { %v272_v5 = vsub.f32 1.0, %v271_v4 }
  0x33   : > { %p676_p8 = pneg %p675_p3 }
  0x34   : > { %v273_v6 = vmul.f32 %v564_v3, %v272_v5 }
  0x35   : > { %p681_p13 = pnand %p680_p12, %p676_p8 }
  0x36   : > { %v274_v7 = vadd.f32 %v564_v3, %v273_v6 }
  0x38   : > { %v276_v8 = vsel %vm275_vm1, %v564_v3, %v274_v7 }
  0x9d   : > { %v269_v9 = vpop.xlane.xlu0 %268 }
  0x9e   : > { %v277_v10 = vmul.f32 %v276_v8, %v269_v9 }
  0xa0   : > { %v278_v11 = vsub.f32 %v265_v0, %v277_v10 }
  0xa2   : > { %v279_v12 = vmul.f32 %v278_v11, %v278_v11 }
  0xa4   : > { %v280_v13 = vsel %vm266_vm0, %v279_v12, 0.0 }
  0xa5   : > { %281 = vadd.xlane.f32.xlu0 %v280_v13 }
 0x118   : > { %v282_v18 = vpop.xlane.xlu0 %281 }
 0x119   : > { %v283_v19 = vmul.f32 %v282_v18, %v276_v8 }
 0x11b   : > { %v284_v20 = vadd.f32 1e-06, %v283_v19 }
 0x11d   : > { %565 = vrsqrt.f32 %v284_v20  ;;  %vm291_vm3 = vweird.f32 %v284_v20 }
 0x123   : > { %v566_v21 = vpop.eup %565 }
 0x124   : > { %v286_v22 = vmul.f32 %v566_v21, %v284_v20  ;;  %vm292_vm2 = vweird.f32 %v566_v21 }
 0x125   : > { %vm293_vm4 = vmor %vm291_vm3, %vm292_vm2 }
 0x126   : > { %v287_v23 = vmul.f32 %v566_v21, %v286_v22 }
 0x128   : > { %v288_v25 = vmul.f32 0.5, %v287_v23 }
 0x12a   : > { %v289_v27 = vsub.f32 1.5, %v288_v25 }
 0x12c   : > { %v290_v28 = vmul.f32 %v566_v21, %v289_v27 }
 0x12e   : > { %v294_v30 = vsel %vm293_vm4, %v566_v21, %v290_v28 }
 0x12f   : > { %v295_v31 = vmul.f32 %v294_v30, %v278_v11 }
 0x131   : > { %v301_v33 = vmul.f32 %v300_v29, %v295_v31 }
 0x133   : > { %v303_v34 = vadd.f32 %v302_v32, %v301_v33 }
 0x135   : > { %469 = vmatmul.msk.f32.vlgmr.msra.gmra.mxu0 %vm266_vm0, %v303_v34 }
 0x1b2   : > { %v332_v36 = vpop.f32.mrf.mxu0 }
 0x1b3   : > { %v333_v37 = vadd.f32 %v562_v35, %v332_v36 }
 0x1b5   : > { %336 = vst.msk [vmem:[%s264_s8] sm:$0xff] %vm335_vm5, %v333_v37 }
 0x1b6   : > { %684 = shalt.err (!%p681_p13)
}
 0x1b7   : > { %484 = dma.vmem_to_hbm [thread:$0]  (%p851_p0), %s352_s9, 128, %s354_s10, %s338_s18  }
 0x1b8 PF: > { %s365_s13 = sand.u32 1, %s723_s15   ;;  %p498_p2 = pnand %p460_p6, %p858_p5 }
 0x1b9   : > { %s366_s29 = scalar_lea.sflag [#allocation4], %s365_s13 }
 0x1ba   : > { %p499_p4 = pneg %p498_p2 }
 0x1bc   : > { %718 = dma.done.wait (%p499_p4), %s366_s29, 128  }
 0x1bd   : > { %720 = vsyncadd (%p499_p4), %s366_s29, 4294967168  ;;  %s21_s20 = sadd.s32 1, %s743_s20   ;;  %s942_s15 = smov %s727_s16 }
 0x1be   : > { %p18_p7 = scmp.ge.s32.totalorder %s21_s20, 4   ;;  %s943_s16 = smov %s731_s17 }
 0x1bf   : > { %s944_s17 = smov %s856_s27  ;;  %s945_s18 = smov %s739_s19 }
 0x1c0   : > { %s946_s19 = smov %s948_s12  ;;  %20 = sbr.rel (!%p18_p7) target bundleno = 7 (0x7), region = 90 }
 0x1c5   :  { %372 = vsyncpa [#allocation3], 1 }
 0x1c6   :  { %374 = vsyncpa [#allocation3 + $0x1], 1 }
 0x1c7   :  { %375 = vsyncpa [#allocation6], 1 }
 0x1c8   :  { %376 = vsyncpa [#allocation4], 1 }
 0x1c9   :  { %378 = vsyncpa [#allocation4 + $0x1], 1 }

</bundles_post_ra>
